<compile_context>
chip_gen: v6e
topology: v6e:2x2x1
jax: 0.10.0
libtpu: 0.0.40
codegen_flags: <defaults>
</compile_context>

<pallas_src>
import functools

import jax
import jax.numpy as jnp
from jax import lax
from jax.experimental import pallas as pl
from jax.experimental.pallas import tpu as pltpu


def _round_up(x, m):
    return (x + m - 1) // m * m


def _vmem_budget_bytes():
    """Generation-aware VMEM cap with ~15% headroom for compiler scratch."""
    cap = 64 << 20  # conservative fallback (v7x per-TensorCore physical VMEM)
    try:
        info = pltpu.get_tpu_info()
        cap = int(getattr(info, "vmem_capacity_bytes", cap))
    except Exception:
        pass
    return int(cap * 0.85)


def _heads_and_pack(h, wmu_ref, bmu_ref, wls_ref, bls_ref, out_ref, *,
                    action_dim, compact):
    """Output heads (mu / log_std), clamp/exp/tanh, lane-dense packed store."""
    mu = jnp.dot(h, wmu_ref[...], preferred_element_type=jnp.float32) + bmu_ref[...]
    log_std = jnp.dot(h, wls_ref[...], preferred_element_type=jnp.float32) + bls_ref[...]
    log_std = jnp.clip(log_std, -5.0, 2.0)
    std = jnp.exp(log_std)
    mean = jnp.tanh(mu)                       # SquashedNormal.mean == tanh(loc)
    if compact:
        # 3*action_dim <= 128: pack [mu | std | tanh(mu)] into ONE 128-lane slab.
        # Lane placement via XLU roll + select (XLU slot is idle here); cuts the
        # padded HBM writeback ~16x vs three 128-lane slabs for small action dims.
        a = action_dim
        col = lax.broadcasted_iota(jnp.int32, mu.shape, 1)
        packed = jnp.where(col < a, mu, 0.0)
        packed = packed + jnp.where((col >= a) & (col < 2 * a),
                                    pltpu.roll(std, shift=a, axis=1), 0.0)
        packed = packed + jnp.where((col >= 2 * a) & (col < 3 * a),
                                    pltpu.roll(mean, shift=2 * a, axis=1), 0.0)
        out_ref[...] = packed
    else:
        a_pad = mu.shape[-1]
        out_ref[:, :a_pad] = mu
        out_ref[:, a_pad:2 * a_pad] = std
        out_ref[:, 2 * a_pad:] = mean


def _actor_kernel_resident(obs_ref, w1_ref, b1_ref, w2_ref, b2_ref,
                           wmu_ref, bmu_ref, wls_ref, bls_ref, out_ref, *,
                           action_dim, compact):
    """Whole-weight-resident path (weights single-buffered in VMEM)."""
    mm_dtype = w1_ref.dtype
    x = obs_ref[...]
    if x.dtype != mm_dtype:
        x = x.astype(mm_dtype)

    # Hidden layer 1: Linear + ReLU (f32 accumulate / elementwise).
    h = jnp.dot(x, w1_ref[...], preferred_element_type=jnp.float32) + b1_ref[...]
    h = jnp.maximum(h, 0.0)

    # Hidden layer 2: Linear + ReLU.
    h = jnp.dot(h.astype(mm_dtype), w2_ref[...],
                preferred_element_type=jnp.float32) + b2_ref[...]
    h = jnp.maximum(h, 0.0).astype(mm_dtype)

    _heads_and_pack(h, wmu_ref, bmu_ref, wls_ref, bls_ref, out_ref,
                    action_dim=action_dim, compact=compact)


def _actor_kernel_ktiled(obs_ref, w1_ref, b1_ref, w2_ref, b2_ref,
                         wmu_ref, bmu_ref, wls_ref, bls_ref, out_ref, acc_ref, *,
                         action_dim, compact):
    """K-tiled path: grid axis over the first hidden dim; only one slab of
    w1 (cols) / w2 (rows) is resident at a time; f32 accumulator in scratch."""
    k = pl.program_id(1)
    mm_dtype = w1_ref.dtype

    @pl.when(k == 0)
    def _():
        acc_ref[...] = jnp.zeros_like(acc_ref)

    x = obs_ref[...]
    if x.dtype != mm_dtype:
        x = x.astype(mm_dtype)

    # Layer-1 slab (h1 columns k*tk:(k+1)*tk) computed and consumed immediately:
    # relu acts per-column, so sum_k relu(x@w1[:,k] + b1[k]) @ w2[k,:] is exact.
    h1 = jnp.dot(x, w1_ref[...], preferred_element_type=jnp.float32) + b1_ref[...]
    h1 = jnp.maximum(h1, 0.0).astype(mm_dtype)
    acc_ref[...] += jnp.dot(h1, w2_ref[...], preferred_element_type=jnp.float32)

    @pl.when(k == pl.num_programs(1) - 1)
    def _():
        h2 = jnp.maximum(acc_ref[...] + b2_ref[...], 0.0).astype(mm_dtype)
        _heads_and_pack(h2, wmu_ref, bmu_ref, wls_ref, bls_ref, out_ref,
                        action_dim=action_dim, compact=compact)


def diag_gaussian_actor(obs, params, *, use_bf16_matmul=True, batch_tile=256,
                        k_tile=None):
    """DiagGaussianActor forward. Returns (mu, std, squashed_mean=tanh(mu))."""
    w1, b1, w2, b2, w3, b3 = params
    B, obs_dim = obs.shape
    h1, h2 = int(w1.shape[1]), int(w2.shape[1])
    action_dim = int(w3.shape[1]) // 2
    a_pad = _round_up(action_dim, 128)
    compact = 3 * action_dim <= 128
    out_cols = a_pad if compact else 3 * a_pad

    mm_dtype = jnp.bfloat16 if use_bf16_matmul else jnp.float32
    sub = 16 if use_bf16_matmul else 8   # sublane packing of the MXU operand dtype
    itemsize = jnp.dtype(mm_dtype).itemsize

    # Split the final layer into mu / log_std heads, pad each head to 128 lanes.
    pad_a = a_pad - action_dim
    w_mu = jnp.pad(w3[:, :action_dim], ((0, 0), (0, pad_a))).astype(mm_dtype)
    w_ls = jnp.pad(w3[:, action_dim:], ((0, 0), (0, pad_a))).astype(mm_dtype)
    b_mu = jnp.pad(b3[:, :action_dim], ((0, 0), (0, pad_a)))
    b_ls = jnp.pad(b3[:, action_dim:], ((0, 0), (0, pad_a)))

    # Pad obs feature dim (K of the first dot) to the sublane packing; pad w1 rows
    # with zeros to match (no-op numerically, keeps the first MXU dot aligned).
    obs_dim_p = _round_up(obs_dim, sub)
    if obs_dim_p != obs_dim:
        obs = jnp.pad(obs, ((0, 0), (0, obs_dim_p - obs_dim)))
        w1 = jnp.pad(w1, ((0, obs_dim_p - obs_dim), (0, 0)))

    # bf16 operands are cast ONCE in the wrapper (halves obs DMA per tile);
    # biases stay f32: all elementwise work is f32 (v5e has no bf16 VPU/EUP).
    obs_in = obs.astype(mm_dtype) if use_bf16_matmul else obs
    w1c = w1.astype(mm_dtype)
    w2c = w2.astype(mm_dtype)

    # Batch tiling: tile is a multiple of the sublane packing (16 bf16 / 8 f32).
    tb = _round_up(min(batch_tile, _round_up(B, sub)), sub)
    b_pad = _round_up(B, tb)
    if b_pad != B:
        obs_in = jnp.pad(obs_in, ((0, b_pad - B), (0, 0)))
    n_btiles = b_pad // tb

    vmem_cap = _vmem_budget_bytes()
    head_bytes = (int(w_mu.size) + int(w_ls.size)) * itemsize \
        + (int(b_mu.size) + int(b_ls.size)) * 4
    w_bytes = (int(w1c.size) + int(w2c.size)) * itemsize \
        + (int(b1.size) + int(b2.size)) * 4 + head_bytes   # counted ONCE (Buffered(1))
    io_bytes = 2 * (tb * obs_dim_p * itemsize + tb * out_cols * 4)  # double-buffered IO
    act_bytes = 4 * tb * max(h1, h2, a_pad) * 4                      # f32 working set
    resident_need = w_bytes + io_bytes + act_bytes

    # Advisory cost estimate so XLA schedules surrounding ops around the call.
    cost = pl.CostEstimate(
        flops=int(2 * b_pad * (obs_dim_p * h1 + h1 * h2 + 2 * h2 * a_pad)),
        transcendentals=int(2 * b_pad * a_pad),
        bytes_accessed=int(obs_in.size * itemsize + b_pad * out_cols * 4 + w_bytes),
    )

    # Decide resident vs K-tiled (v7x: 64 MiB VMEM can't hold big hidden layers).
    if k_tile is None and resident_need > vmem_cap:
        k_tile = 512

    if k_tile is None:
        # ---------------- whole-weight-resident path ----------------
        def const(arr):
            # Grid-invariant -> single buffer (double-buffering would only double
            # the VMEM footprint without hiding any DMA).
            return pl.BlockSpec(arr.shape, lambda i: (0,) * arr.ndim,
                                pipeline_mode=pl.Buffered(1))

        kernel = functools.partial(_actor_kernel_resident,
                                   action_dim=action_dim, compact=compact)
        vmem_limit = int(min(vmem_cap, max(32 << 20, int(1.25 * resident_need))))

        packed = pl.pallas_call(
            kernel,
            out_shape=jax.ShapeDtypeStruct((b_pad, out_cols), jnp.float32),
            grid=(n_btiles,),
            in_specs=[
                pl.BlockSpec((tb, obs_dim_p), lambda i: (i, 0)),
                const(w1c), const(b1), const(w2c), const(b2),
                const(w_mu), const(b_mu), const(w_ls), const(b_ls),
            ],
            out_specs=pl.BlockSpec((tb, out_cols), lambda i: (i, 0)),
            compiler_params=pltpu.CompilerParams(
                dimension_semantics=("parallel",),
                vmem_limit_bytes=vmem_limit,
            ),
            cost_estimate=cost,
        )(obs_in, w1c, b1, w2c, b2, w_mu, b_mu, w_ls, b_ls)
    else:
        # ---------------- K-tiled reduction path ----------------
        tk = min(_round_up(k_tile, 128), _round_up(h1, 128))
        h1_pad = _round_up(h1, tk)
        if h1_pad != h1:
            # Zero-pad the hidden-1 dim: relu(x@0 + 0) = 0 contributes nothing.
            w1c = jnp.pad(w1c, ((0, 0), (0, h1_pad - h1)))
            b1p = jnp.pad(b1, ((0, 0), (0, h1_pad - h1)))
            w2c = jnp.pad(w2c, ((0, h1_pad - h1), (0, 0)))
        else:
            b1p = b1
        nk = h1_pad // tk

        def const2(arr):
            return pl.BlockSpec(arr.shape, lambda i, k: (0,) * arr.ndim,
                                pipeline_mode=pl.Buffered(1))

        kernel = functools.partial(_actor_kernel_ktiled,
                                   action_dim=action_dim, compact=compact)
        ktiled_need = (head_bytes + int(b2.size) * 4
                       + 2 * ((obs_dim_p * tk + tk * h2) * itemsize + tk * 4)
                       + io_bytes + act_bytes + tb * h2 * 4)
        vmem_limit = int(min(vmem_cap, max(32 << 20, int(1.25 * ktiled_need))))

        packed = pl.pallas_call(
            kernel,
            out_shape=jax.ShapeDtypeStruct((b_pad, out_cols), jnp.float32),
            grid=(n_btiles, nk),
            in_specs=[
                pl.BlockSpec((tb, obs_dim_p), lambda i, k: (i, 0)),
                pl.BlockSpec((obs_dim_p, tk), lambda i, k: (0, k)),
                pl.BlockSpec((1, tk), lambda i, k: (0, k)),
                pl.BlockSpec((tk, h2), lambda i, k: (k, 0)),
                const2(b2),
                const2(w_mu), const2(b_mu), const2(w_ls), const2(b_ls),
            ],
            out_specs=pl.BlockSpec((tb, out_cols), lambda i, k: (i, 0)),
            scratch_shapes=[pltpu.VMEM((tb, h2), jnp.float32)],
            compiler_params=pltpu.CompilerParams(
                dimension_semantics=("parallel", "arbitrary"),
                vmem_limit_bytes=vmem_limit,
            ),
            cost_estimate=cost,
        )(obs_in, w1c, b1p, w2c, b2, w_mu, b_mu, w_ls, b_ls)

    if compact:
        mu = packed[:B, :action_dim]
        std = packed[:B, action_dim:2 * action_dim]
        mean = packed[:B, 2 * action_dim:3 * action_dim]
    else:
        mu = packed[:B, :action_dim]
        std = packed[:B, a_pad:a_pad + action_dim]
        mean = packed[:B, 2 * a_pad:2 * a_pad + action_dim]
    return mu, std, mean


def init_params(key, observation_dim, action_dim, hidden_dims):
    """Deterministic init matching the MLP structure: Linear-ReLU-Linear-ReLU-Linear."""
    dims = [observation_dim, *hidden_dims, action_dim * 2]
    params = []
    for i in range(len(dims) - 1):
        key, wk = jax.random.split(key)
        fan_in = dims[i]
        bound = 1.0 / jnp.sqrt(fan_in)
        w = jax.random.uniform(wk, (dims[i], dims[i + 1]), jnp.float32, -bound, bound)
        b = jnp.zeros((1, dims[i + 1]), jnp.float32)
        params += [w, b]
    return tuple(params)


def reference_forward(obs, params, mm_dtype=jnp.float32):
    w1, b1, w2, b2, w3, b3 = params

    def mm(x, w):
        return jnp.dot(x.astype(mm_dtype), w.astype(mm_dtype),
                       preferred_element_type=jnp.float32)

    h = jnp.maximum(mm(obs, w1) + b1, 0.0)
    h = jnp.maximum(mm(h, w2) + b2, 0.0)
    out = mm(h, w3) + b3
    action_dim = w3.shape[1] // 2
    mu, log_std = out[:, :action_dim], out[:, action_dim:]
    log_std = jnp.clip(log_std, -5.0, 2.0)
    return mu, jnp.exp(log_std), jnp.tanh(mu)


if __name__ == "__main__":
    key = jax.random.PRNGKey(0)

    # --- small shapes exercising the VMEM-resident path (compact output) ------
    batch, observation_dim, action_dim, hidden_dims = 24, 32, 8, (32, 32)
    key, pkey, okey = jax.random.split(key, 3)
    params = init_params(pkey, observation_dim, action_dim, hidden_dims)
    obs = jax.random.normal(okey, (batch, observation_dim), jnp.float32)

    # bf16-MXU path, small batch tile -> exercises the multi-tile pipelined grid.
    mu, std, mean = diag_gaussian_actor(obs, params, use_bf16_matmul=True, batch_tile=16)
    jax.block_until_ready((mu, std, mean))

    mu_bf, std_bf, mean_bf = reference_forward(obs, params, mm_dtype=jnp.bfloat16)
    assert jnp.allclose(mu, mu_bf, atol=1e-4, rtol=1e-4)
    assert jnp.allclose(std, std_bf, atol=1e-4, rtol=1e-4)
    assert jnp.allclose(mean, mean_bf, atol=1e-4, rtol=1e-4)

    mu_f, std_f, mean_f = reference_forward(obs, params, mm_dtype=jnp.float32)
    assert jnp.allclose(mu, mu_f, atol=2e-2, rtol=2e-2)
    assert jnp.allclose(std, std_f, atol=2e-2, rtol=2e-2)
    assert jnp.allclose(mean, mean_f, atol=2e-2, rtol=2e-2)

    # f32-everywhere path must match the f32 reference tightly (original semantics).
    mu2, std2, mean2 = diag_gaussian_actor(obs, params, use_bf16_matmul=False)
    jax.block_until_ready((mu2, std2, mean2))
    assert jnp.allclose(mu2, mu_f, atol=1e-5, rtol=1e-5)
    assert jnp.allclose(std2, std_f, atol=1e-5, rtol=1e-5)
    assert jnp.allclose(mean2, mean_f, atol=1e-5, rtol=1e-5)

    # --- non-compact output path (3*action_dim > 128) -------------------------
    key, pkey2, okey2 = jax.random.split(key, 3)
    params_wide = init_params(pkey2, observation_dim, 48, hidden_dims)
    obs2 = jax.random.normal(okey2, (16, observation_dim), jnp.float32)
    mu3, std3, mean3 = diag_gaussian_actor(obs2, params_wide, use_bf16_matmul=False)
    jax.block_until_ready((mu3, std3, mean3))
    mur, stdr, meanr = reference_forward(obs2, params_wide, mm_dtype=jnp.float32)
    assert jnp.allclose(mu3, mur, atol=1e-5, rtol=1e-5)
    assert jnp.allclose(std3, stdr, atol=1e-5, rtol=1e-5)
    assert jnp.allclose(mean3, meanr, atol=1e-5, rtol=1e-5)

    # --- K-tiled reduction path (forced here; selected automatically when the
    #     weights don't fit VMEM, e.g. large hidden dims on v7x's 64 MiB) -------
    key, pkey3, okey3 = jax.random.split(key, 3)
    params_big = init_params(pkey3, observation_dim, action_dim, (256, 256))
    obs3 = jax.random.normal(okey3, (24, observation_dim), jnp.float32)
    mu4, std4, mean4 = diag_gaussian_actor(obs3, params_big, use_bf16_matmul=False,
                                           batch_tile=16, k_tile=128)
    jax.block_until_ready((mu4, std4, mean4))
    mur4, stdr4, meanr4 = reference_forward(obs3, params_big, mm_dtype=jnp.float32)
    assert jnp.allclose(mu4, mur4, atol=1e-4, rtol=1e-4)
    assert jnp.allclose(std4, stdr4, atol=1e-4, rtol=1e-4)
    assert jnp.allclose(mean4, meanr4, atol=1e-4, rtol=1e-4)

    # Host-side finiteness check (torch.isfinite assert has no in-kernel equivalent).
    assert bool(jnp.all(jnp.isfinite(mu))) and bool(jnp.all(jnp.isfinite(std)))

    print("KERNEL_OK")
</pallas_src>

<mosaic_0001>
module attributes {stable_mosaic.version = 11 : i64} {
  func.func @_actor_kernel_resident(%arg0: i32, %arg1: memref<16x32xbf16, #tpu.memory_space<vmem>>, %arg2: memref<32x32xbf16, #tpu.memory_space<vmem>>, %arg3: memref<1x32xf32, #tpu.memory_space<vmem>>, %arg4: memref<32x32xbf16, #tpu.memory_space<vmem>>, %arg5: memref<1x32xf32, #tpu.memory_space<vmem>>, %arg6: memref<32x128xbf16, #tpu.memory_space<vmem>>, %arg7: memref<1x128xf32, #tpu.memory_space<vmem>>, %arg8: memref<32x128xbf16, #tpu.memory_space<vmem>>, %arg9: memref<1x128xf32, #tpu.memory_space<vmem>>, %arg10: memref<16x128xf32, #tpu.memory_space<vmem>>) attributes {dimension_semantics = [#tpu.dimension_semantics<parallel>], iteration_bounds = array<i64: 2>, scalar_prefetch = 0 : i64, scratch_operands = 0 : i64, tpu.core_type = #tpu.core_type<tc>, window_params = [{transform_indices = @transform_0, window_bounds = array<i64: 16, 32>}, {pipeline_mode = #tpu.pipeline_mode<synchronous>, transform_indices = @transform_1, window_bounds = array<i64: 32, 32>}, {pipeline_mode = #tpu.pipeline_mode<synchronous>, transform_indices = @transform_2, window_bounds = array<i64: 1, 32>}, {pipeline_mode = #tpu.pipeline_mode<synchronous>, transform_indices = @transform_3, window_bounds = array<i64: 32, 32>}, {pipeline_mode = #tpu.pipeline_mode<synchronous>, transform_indices = @transform_4, window_bounds = array<i64: 1, 32>}, {pipeline_mode = #tpu.pipeline_mode<synchronous>, transform_indices = @transform_5, window_bounds = array<i64: 32, 128>}, {pipeline_mode = #tpu.pipeline_mode<synchronous>, transform_indices = @transform_6, window_bounds = array<i64: 1, 128>}, {pipeline_mode = #tpu.pipeline_mode<synchronous>, transform_indices = @transform_7, window_bounds = array<i64: 32, 128>}, {pipeline_mode = #tpu.pipeline_mode<synchronous>, transform_indices = @transform_8, window_bounds = array<i64: 1, 128>}, {transform_indices = @transform_9, window_bounds = array<i64: 16, 128>}]} {
    %c0 = arith.constant 0 : index
    %c0_0 = arith.constant 0 : index
    %0 = vector.load %arg1[%c0, %c0_0] : memref<16x32xbf16, #tpu.memory_space<vmem>>, vector<16x32xbf16>
    %c0_1 = arith.constant 0 : index
    %c0_2 = arith.constant 0 : index
    %1 = vector.load %arg2[%c0_1, %c0_2] : memref<32x32xbf16, #tpu.memory_space<vmem>>, vector<32x32xbf16>
    %cst = arith.constant dense<0.000000e+00> : vector<16x32xf32>
    %2 = tpu.matmul %0, %1, %cst {dimension_numbers = #tpu.dot_dimension_numbers<[1], [0], [0], [1], [0, 0, 1, 1], [], []>} : vector<16x32xbf16>, vector<32x32xbf16>, vector<16x32xf32> -> vector<16x32xf32>
    %c0_3 = arith.constant 0 : index
    %c0_4 = arith.constant 0 : index
    %3 = vector.load %arg3[%c0_3, %c0_4] : memref<1x32xf32, #tpu.memory_space<vmem>>, vector<1x32xf32>
    %4 = vector.broadcast %3 : vector<1x32xf32> to vector<16x32xf32>
    %5 = arith.addf %2, %4 : vector<16x32xf32>
    %cst_5 = arith.constant 0.000000e+00 : f32
    %6 = vector.broadcast %cst_5 : f32 to vector<16x32xf32>
    %7 = arith.maximumf %5, %6 : vector<16x32xf32>
    %8 = arith.truncf %7 : vector<16x32xf32> to vector<16x32xbf16>
    %c0_6 = arith.constant 0 : index
    %c0_7 = arith.constant 0 : index
    %9 = vector.load %arg4[%c0_6, %c0_7] : memref<32x32xbf16, #tpu.memory_space<vmem>>, vector<32x32xbf16>
    %cst_8 = arith.constant dense<0.000000e+00> : vector<16x32xf32>
    %10 = tpu.matmul %8, %9, %cst_8 {dimension_numbers = #tpu.dot_dimension_numbers<[1], [0], [0], [1], [0, 0, 1, 1], [], []>} : vector<16x32xbf16>, vector<32x32xbf16>, vector<16x32xf32> -> vector<16x32xf32>
    %c0_9 = arith.constant 0 : index
    %c0_10 = arith.constant 0 : index
    %11 = vector.load %arg5[%c0_9, %c0_10] : memref<1x32xf32, #tpu.memory_space<vmem>>, vector<1x32xf32>
    %12 = vector.broadcast %11 : vector<1x32xf32> to vector<16x32xf32>
    %13 = arith.addf %10, %12 : vector<16x32xf32>
    %cst_11 = arith.constant 0.000000e+00 : f32
    %14 = vector.broadcast %cst_11 : f32 to vector<16x32xf32>
    %15 = arith.maximumf %13, %14 : vector<16x32xf32>
    %16 = arith.truncf %15 : vector<16x32xf32> to vector<16x32xbf16>
    %c0_12 = arith.constant 0 : index
    %c0_13 = arith.constant 0 : index
    %17 = vector.load %arg6[%c0_12, %c0_13] : memref<32x128xbf16, #tpu.memory_space<vmem>>, vector<32x128xbf16>
    %cst_14 = arith.constant dense<0.000000e+00> : vector<16x128xf32>
    %18 = tpu.matmul %16, %17, %cst_14 {dimension_numbers = #tpu.dot_dimension_numbers<[1], [0], [0], [1], [0, 0, 1, 1], [], []>} : vector<16x32xbf16>, vector<32x128xbf16>, vector<16x128xf32> -> vector<16x128xf32>
    %c0_15 = arith.constant 0 : index
    %c0_16 = arith.constant 0 : index
    %19 = vector.load %arg7[%c0_15, %c0_16] : memref<1x128xf32, #tpu.memory_space<vmem>>, vector<1x128xf32>
    %20 = vector.broadcast %19 : vector<1x128xf32> to vector<16x128xf32>
    %21 = arith.addf %18, %20 : vector<16x128xf32>
    %c0_17 = arith.constant 0 : index
    %c0_18 = arith.constant 0 : index
    %22 = vector.load %arg8[%c0_17, %c0_18] : memref<32x128xbf16, #tpu.memory_space<vmem>>, vector<32x128xbf16>
    %cst_19 = arith.constant dense<0.000000e+00> : vector<16x128xf32>
    %23 = tpu.matmul %16, %22, %cst_19 {dimension_numbers = #tpu.dot_dimension_numbers<[1], [0], [0], [1], [0, 0, 1, 1], [], []>} : vector<16x32xbf16>, vector<32x128xbf16>, vector<16x128xf32> -> vector<16x128xf32>
    %c0_20 = arith.constant 0 : index
    %c0_21 = arith.constant 0 : index
    %24 = vector.load %arg9[%c0_20, %c0_21] : memref<1x128xf32, #tpu.memory_space<vmem>>, vector<1x128xf32>
    %25 = vector.broadcast %24 : vector<1x128xf32> to vector<16x128xf32>
    %26 = arith.addf %23, %25 : vector<16x128xf32>
    %cst_22 = arith.constant -5.000000e+00 : f32
    %cst_23 = arith.constant 2.000000e+00 : f32
    %27 = vector.broadcast %cst_22 : f32 to vector<16x128xf32>
    %28 = arith.maximumf %27, %26 : vector<16x128xf32>
    %29 = vector.broadcast %cst_23 : f32 to vector<16x128xf32>
    %30 = arith.minimumf %29, %28 : vector<16x128xf32>
    %31 = math.exp %30 : vector<16x128xf32>
    %32 = math.tanh %21 : vector<16x128xf32>
    %33 = tpu.iota {dimensions = array<i32: 1>} : vector<16x128xi32>
    %c8_i32 = arith.constant 8 : i32
    %34 = vector.broadcast %c8_i32 : i32 to vector<16x128xi32>
    %35 = arith.cmpi slt, %33, %34 : vector<16x128xi32>
    %cst_24 = arith.constant 0.000000e+00 : f32
    %36 = vector.broadcast %cst_24 : f32 to vector<16x128xf32>
    %37 = arith.select %35, %21, %36 : vector<16x128xi1>, vector<16x128xf32>
    %c8_i32_25 = arith.constant 8 : i32
    %38 = vector.broadcast %c8_i32_25 : i32 to vector<16x128xi32>
    %39 = arith.cmpi sge, %33, %38 : vector<16x128xi32>
    %c16_i32 = arith.constant 16 : i32
    %40 = vector.broadcast %c16_i32 : i32 to vector<16x128xi32>
    %41 = arith.cmpi slt, %33, %40 : vector<16x128xi32>
    %42 = arith.andi %39, %41 : vector<16x128xi1>
    %c8_i32_26 = arith.constant 8 : i32
    %43 = tpu.dynamic_rotate %31 by %c8_i32_26 dim 1 : vector<16x128xf32>, i32 -> vector<16x128xf32>
    %cst_27 = arith.constant 0.000000e+00 : f32
    %44 = vector.broadcast %cst_27 : f32 to vector<16x128xf32>
    %45 = arith.select %42, %43, %44 : vector<16x128xi1>, vector<16x128xf32>
    %46 = arith.addf %37, %45 : vector<16x128xf32>
    %c16_i32_28 = arith.constant 16 : i32
    %47 = vector.broadcast %c16_i32_28 : i32 to vector<16x128xi32>
    %48 = arith.cmpi sge, %33, %47 : vector<16x128xi32>
    %c24_i32 = arith.constant 24 : i32
    %49 = vector.broadcast %c24_i32 : i32 to vector<16x128xi32>
    %50 = arith.cmpi slt, %33, %49 : vector<16x128xi32>
    %51 = arith.andi %48, %50 : vector<16x128xi1>
    %c16_i32_29 = arith.constant 16 : i32
    %52 = tpu.dynamic_rotate %32 by %c16_i32_29 dim 1 : vector<16x128xf32>, i32 -> vector<16x128xf32>
    %cst_30 = arith.constant 0.000000e+00 : f32
    %53 = vector.broadcast %cst_30 : f32 to vector<16x128xf32>
    %54 = arith.select %51, %52, %53 : vector<16x128xi1>, vector<16x128xf32>
    %55 = arith.addf %46, %54 : vector<16x128xf32>
    %c0_31 = arith.constant 0 : index
    %c0_32 = arith.constant 0 : index
    %56 = vector.load %arg10[%c0_31, %c0_32] : memref<16x128xf32, #tpu.memory_space<vmem>>, vector<16x128xf32>
    tpu.vector_store %arg10[%c0_31, %c0_32], %55 {strides = array<i32>} : memref<16x128xf32, #tpu.memory_space<vmem>>, vector<16x128xf32>,
    return
  }
  func.func @transform_0(%arg0: i32) -> (i32, i32) {
    %c0_i32 = arith.constant 0 : i32
    %c0_i32_0 = arith.constant 0 : i32
    return %arg0, %c0_i32 : i32, i32
  }
  func.func @transform_1(%arg0: i32) -> (i32, i32) {
    %c0_i32 = arith.constant 0 : i32
    %c0_i32_0 = arith.constant 0 : i32
    %c0_i32_1 = arith.constant 0 : i32
    return %c0_i32, %c0_i32_0 : i32, i32
  }
  func.func @transform_2(%arg0: i32) -> (i32, i32) {
    %c0_i32 = arith.constant 0 : i32
    %c0_i32_0 = arith.constant 0 : i32
    %c0_i32_1 = arith.constant 0 : i32
    return %c0_i32, %c0_i32_0 : i32, i32
  }
  func.func @transform_3(%arg0: i32) -> (i32, i32) {
    %c0_i32 = arith.constant 0 : i32
    %c0_i32_0 = arith.constant 0 : i32
    %c0_i32_1 = arith.constant 0 : i32
    return %c0_i32, %c0_i32_0 : i32, i32
  }
  func.func @transform_4(%arg0: i32) -> (i32, i32) {
    %c0_i32 = arith.constant 0 : i32
    %c0_i32_0 = arith.constant 0 : i32
    %c0_i32_1 = arith.constant 0 : i32
    return %c0_i32, %c0_i32_0 : i32, i32
  }
  func.func @transform_5(%arg0: i32) -> (i32, i32) {
    %c0_i32 = arith.constant 0 : i32
    %c0_i32_0 = arith.constant 0 : i32
    %c0_i32_1 = arith.constant 0 : i32
    return %c0_i32, %c0_i32_0 : i32, i32
  }
  func.func @transform_6(%arg0: i32) -> (i32, i32) {
    %c0_i32 = arith.constant 0 : i32
    %c0_i32_0 = arith.constant 0 : i32
    %c0_i32_1 = arith.constant 0 : i32
    return %c0_i32, %c0_i32_0 : i32, i32
  }
  func.func @transform_7(%arg0: i32) -> (i32, i32) {
    %c0_i32 = arith.constant 0 : i32
    %c0_i32_0 = arith.constant 0 : i32
    %c0_i32_1 = arith.constant 0 : i32
    return %c0_i32, %c0_i32_0 : i32, i32
  }
  func.func @transform_8(%arg0: i32) -> (i32, i32) {
    %c0_i32 = arith.constant 0 : i32
    %c0_i32_0 = arith.constant 0 : i32
    %c0_i32_1 = arith.constant 0 : i32
    return %c0_i32, %c0_i32_0 : i32, i32
  }
  func.func @transform_9(%arg0: i32) -> (i32, i32) {
    %c0_i32 = arith.constant 0 : i32
    %c0_i32_0 = arith.constant 0 : i32
    return %arg0, %c0_i32 : i32, i32
  }
}

</mosaic_0001>

<bundles_post_ra>
// kernel: tpu_custom_call.1
= control target key start
LH: loop header
LB: loop body
LE: loop exit
PB: predicated region body
PF: predicated region fallthrough
CT: control target
= control target key end

     0   :  { %s1583_s0 = inlined_call_operand.hbm [shape: bf16[32,32], index: 0, kind: input, shape index: {}]   ;;  %s1584_s1 = inlined_call_operand.hbm [shape: bf16[32,32], index: 1, kind: input, shape index: {}]   ;;  %s1585_s2 = inlined_call_operand.vmem [shape: f32[1,32], index: 2, kind: input, shape index: {}]   ;;  %s1586_s3 = inlined_call_operand.hbm [shape: bf16[32,32], index: 3, kind: input, shape index: {}]   ;;  %s1587_s4 = inlined_call_operand.vmem [shape: f32[1,32], index: 4, kind: input, shape index: {}]   ;;  %s1588_s5 = inlined_call_operand.hbm [shape: bf16[32,128], index: 5, kind: input, shape index: {}]   ;;  %s1589_s6 = inlined_call_operand.vmem [shape: f32[1,128], index: 6, kind: input, shape index: {}]   ;;  %s1590_s7 = inlined_call_operand.hbm [shape: bf16[32,128], index: 7, kind: input, shape index: {}]   ;;  %s1591_s8 = inlined_call_operand.vmem [shape: f32[1,128], index: 8, kind: input, shape index: {}]   ;;  %s1592_s9 = inlined_call_operand.hbm [shape: f32[32,128], index: 9, kind: output, shape index: {}]  }
   0x1   :  { %1599 = sst [smem:[#allocation16_spill]] %s1584_s1 }
   0x2   :  { %1600 = sst [smem:[#allocation17_spill]] %s1586_s3 }
   0x3   :  { %1601 = sst [smem:[#allocation18_spill]] %s1588_s5 }
   0x4   :  { %14 = vsyncpa [#allocation3], 0 }
   0x5   :  { %16 = vsyncpa [#allocation3 + $0x1], 0 }
   0x6   :  { %17 = vsyncpa [#allocation6], 0 }
   0x7   :  { %18 = vsyncpa [#allocation9], 0 }
   0x8   :  { %19 = vsyncpa [#allocation4], 0 }
   0x9   :  { %21 = vsyncpa [#allocation4 + $0x1], 0  ;;  %s1320_s30 = smov 0   ;;  %s1322_s10 = smov 0  }
   0xa   :  { %s1324_s11 = smov 0   ;;  %s1326_s12 = smov 0  }
   0xb LB: > { %s1341_s13 = sadd.s32 4294967295, %s1255_s12   ;;  %s855_s14 = sadd.s32 4294967294, %s1255_s12   ;;  %s1255_s12 = sphi %s1326_s12, %s1629_s12   ;;  %s1251_s11 = sphi %s1324_s11, %s1628_s11   ;;  %s1247_s10 = sphi %s1322_s10, %s1627_s10   ;;  %s1243_s30 = sphi %s1320_s30, %s1626_s30  }
   0xc   : > { %p47_p0 = scmp.ne.s32.totalorder %s1247_s10, %s1243_s30  ;;  %p1593_p1 = scmp.eq.s32.totalorder %s1341_s13, 0 }
   0xd   : > { %p239_p2 = scmp.eq.s32.totalorder %s1341_s13, 1  ;;  %p245_p3 = scmp.eq.s32.totalorder %s855_s14, 1 }
   0xe   : > { %p1350_p4 = por %p1593_p1, %p47_p0  ;;  %p856_p5 = scmp.ge.s32.totalorder %s1255_s12, 1 }
   0xf   : > { %p1355_p6 = por %p245_p3, %p47_p0  ;;  %p252_p7 = scmp.lt.s32.totalorder %s1255_s12, 3 }
  0x10   : > { %s1602_s15 = scalar_select %p1350_p4, 1, 0 }
  0x11   : > { %s1603_s16 = scalar_select %p1355_p6, 1, 0 }
  0x12   : > { %p1360_p8 = pnand %p856_p5, %p252_p7  ;;  %s1257_s18 = smov [#allocation5]  }
  0x13   : > { %s264_s19 = sshll.u32 %s1257_s18, 4  ;;  %s1258_s21 = smov [#allocation8]   ;;  %s265_s19 = int_to_ptr.vmem [resolvable:$true] %s264_s19 }
  0x14   : > { %s1604_s17 = scalar_select %p1360_p8, 1, 0 }
  0x15   : > { %p960_p9 = pneg %p1360_p8  ;;  %s296_s22 = sshll.u32 %s1258_s21, 4  ;;  %s297_s22 = int_to_ptr.vmem [resolvable:$true] %s296_s22 }
  0x16   : > { %s1259_s23 = smov [#allocation7]   ;;  %s1062_s25 = scalar_lea.vmem %s265_s19, 256 }
  0x17   : > { %p1369_p11 = pnand %p960_p9, %p1593_p1  ;;  %s280_s24 = sshll.u32 %s1259_s23, 4  ;;  %s281_s24 = int_to_ptr.vmem [resolvable:$true] %s280_s24 }
  0x18   : > { %p1063_p13 = scmp.ne.s32.totalorder %s265_s19, %s1062_s25  ;;  %p1070_p5 = scmp.lt.s32.totalorder %s265_s19, %s265_s19 }
  0x19   : > { %p1053_p12 = pneg %p1369_p11  ;;  %p1071_p7 = scmp.lt.s32.totalorder %s1062_s25, %s1062_s25 }
  0x1b   : > { %p1065_p0 = pnand %p1063_p13, %p1053_p12  ;;  %p1072_p9 = por %p1071_p7, %p1070_p5 }
  0x1d   : > { %p1066_p3 = pneg %p1065_p0 }
  0x1f   : > { %p1073_p10 = pnand %p1072_p9, %p1066_p3 }
  0x21   : > { %1076 = shalt.err (!%p1073_p10)
}
  0x22   : > { %s1594_s26 = smov 64   ;;  %s1595_s27 = smov 4  }
  0x23   : > { %s1606_s1 = sld [smem:[#allocation16_spill]]  ;;  %s1088_s14 = scalar_lea.vmem %s297_s22, 256 }
  0x24   : > { %p1089_p13 = scmp.ne.s32.totalorder %s297_s22, %s1088_s14  ;;  %p1096_p3 = scmp.lt.s32.totalorder %s297_s22, %s297_s22 }
  0x25   : > { %p1097_p10 = scmp.lt.s32.totalorder %s1088_s14, %s1088_s14 }
  0x26   : > { %p1091_p0 = pnand %p1089_p13, %p1053_p12 }
  0x27   : > { %p1098_p7 = por %p1097_p10, %p1096_p3 }
  0x28   : > { %p1092_p5 = pneg %p1091_p0 }
  0x29   : > { %963 = dma.hbm_to_vmem [thread:$0]  (!%p1369_p11), %s1606_s1, 256, %s265_s19, [#allocation6], %s1594_s26, %s1594_s26, %s1595_s27  }
  0x2a   : > { %p1099_p9 = pnand %p1098_p7, %p1092_p5 }
  0x2c   : > { %1102 = shalt.err (!%p1099_p9)
}
  0x2d   : > { %s1607_s5 = sld [smem:[#allocation18_spill]]  ;;  %s1114_s19 = scalar_lea.vmem %s281_s24, 256 }
  0x2e   : > { %p1115_p1 = scmp.ne.s32.totalorder %s281_s24, %s1114_s19  ;;  %p1122_p3 = scmp.lt.s32.totalorder %s281_s24, %s281_s24 }
  0x2f   : > { %p1123_p5 = scmp.lt.s32.totalorder %s1114_s19, %s1114_s19 }
  0x30   : > { %p1117_p13 = pnand %p1115_p1, %p1053_p12 }
  0x31   : > { %p1124_p10 = por %p1123_p5, %p1122_p3 }
  0x32   : > { %p1118_p0 = pneg %p1117_p13 }
  0x33   : > { %969 = dma.hbm_to_vmem [thread:$0]  (!%p1369_p11), %s1607_s5, 256, %s297_s22, [#allocation9], %s1594_s26, %s1594_s26, %s1595_s27  }
  0x34   : > { %p1125_p7 = pnand %p1124_p10, %p1118_p0 }
  0x36   : > { %1128 = shalt.err (!%p1125_p7)
}
  0x37   : > { %s1608_s3 = sld [smem:[#allocation17_spill]]  ;;  %s1262_s22 = smov [#allocation10]  }
  0x38   : > { %s312_s28 = sshll.u32 %s1262_s22, 4  ;;  %s313_s28 = int_to_ptr.vmem [resolvable:$true] %s312_s28 }
  0x39   : > { %s1140_s29 = scalar_lea.vmem %s313_s28, 256  ;;  %p1148_p0 = scmp.lt.s32.totalorder %s313_s28, %s313_s28 }
  0x3a   : > { %p1141_p1 = scmp.ne.s32.totalorder %s313_s28, %s1140_s29  ;;  %p1149_p3 = scmp.lt.s32.totalorder %s1140_s29, %s1140_s29 }
  0x3c   : > { %p1143_p9 = pnand %p1141_p1, %p1053_p12  ;;  %p1150_p5 = por %p1149_p3, %p1148_p0 }
  0x3d   : > { %966 = dma.hbm_to_vmem [thread:$0]  (!%p1369_p11), %s1608_s3, 256, %s281_s24, [#allocation6], %s1594_s26, %s1594_s26, %s1595_s27  }
  0x3e   : > { %p1144_p13 = pneg %p1143_p9 }
  0x40   : > { %p1151_p10 = pnand %p1150_p5, %p1144_p13 }
  0x42   : > { %1154 = shalt.err (!%p1151_p10)
}
  0x43   : > { %972 = dma.hbm_to_vmem [thread:$0]  (!%p1369_p11), %s1590_s7, 256, %s313_s28, [#allocation9], %s1594_s26, %s1594_s26, %s1595_s27  }
  0x44   : > { %s1420_s18 = sadd.s32 1, %s1255_s12   ;;  %s34_s20 = sadd.s32 1, %s1251_s11 }
  0x45   : > { %s31_s21 = ssub.s32 %s1255_s12, %s1420_s18  ;;  %p41_p12 = scmp.ne.s32.totalorder %s1251_s11, %s1247_s10 }
  0x46   : > { %p32_p7 = scmp.eq.s32.totalorder %s31_s21, 0  ;;  %p42_p1 = scmp.eq.s32.totalorder %s1255_s12, 0 }
  0x47   : > { %p1430_p9 = por %p239_p2, %p41_p12  ;;  %p985_p13 = scmp.lt.s32.totalorder %s1255_s12, 2 }
  0x48   : > { %s1436_s23 = scalar_select %p32_p7, %s1251_s11, %s34_s20  }
  0x49   : > { %s1609_s19 = scalar_select %p1430_p9, 1, 0 }
  0x4a   : > { %p43_p0 = por %p42_p1, %p41_p12  ;;  %s329_s25 = sand.u32 1, %s1251_s11  }
  0x4b   : > { %s862_s22 = sshll.u32 %s329_s25, 3  ;;  %s894_s28 = sshll.u32 %s1255_s12, 7 }
  0x4c   : > { %s1443_s14 = scalar_lea.hbm %s1583_s0, %s894_s28  ;;  %s333_s21 = scalar_lea.vmem [#allocation2], %s862_s22 }
  0x4d   : > { %s340_s26 = sshll.u32 %s333_s21, 4  ;;  %p1447_p2 = pnand %p985_p13, %p43_p0  ;;  %s1445_s26 = int_to_ptr.vmem [resolvable:$true] %s340_s26 }
  0x4e   : > { %s1451_s20 = scalar_lea.sflag [#allocation3], %s329_s25  ;;  %s1155_s1 = scalar_lea.hbm %s1443_s14, 128 }
  0x4f   : > { %p1156_p11 = scmp.ne.s32.totalorder %s1443_s14, %s1155_s1  ;;  %p1157_p3 = pneg %p1447_p2 }
  0x50   : > { %s1160_s22 = scalar_lea.hbm %s1583_s0, 256  ;;  %p1161_p12 = scmp.lt.s32.totalorder %s1443_s14, %s1583_s0 }
  0x51   : > { %p1158_p5 = pnand %p1157_p3, %p1156_p11  ;;  %p1162_p7 = scmp.lt.s32.totalorder %s1160_s22, %s1155_s1 }
  0x53   : > { %p1159_p10 = pneg %p1158_p5  ;;  %p1163_p1 = por %p1162_p7, %p1161_p12 }
  0x55   : > { %p1164_p13 = pnand %p1163_p1, %p1159_p10 }
  0x57   : > { %1167 = shalt.err (!%p1164_p13)
}
  0x58   : > { %s1168_s25 = scalar_lea.vmem %s1445_s26, 128  ;;  %s1263_s3 = smov [#allocation2]  }
  0x59   : > { %p1169_p0 = scmp.ne.s32.totalorder %s1445_s26, %s1168_s25  ;;  %s1173_s5 = sshll.u32 %s1263_s3, 4  ;;  %s1174_s5 = int_to_ptr.vmem [resolvable:$false] %s1173_s5 }
  0x5a   : > { %s1175_s28 = scalar_lea.vmem %s1174_s5, 256  ;;  %p1176_p5 = scmp.lt.s32.totalorder %s1445_s26, %s1174_s5 }
  0x5b   : > { %p1171_p6 = pnand %p1169_p0, %p1157_p3  ;;  %p1177_p9 = scmp.lt.s32.totalorder %s1175_s28, %s1168_s25 }
  0x5d   : > { %p1172_p11 = pneg %p1171_p6  ;;  %p1178_p4 = por %p1177_p9, %p1176_p5 }
  0x5f   : > { %p1179_p8 = pnand %p1178_p4, %p1172_p11 }
  0x61   : > { %1182 = shalt.err (!%p1179_p8)
}
  0x62   : > { %s1611_s1 = smov 4   ;;  %s1612_s29 = smov 64  }
  0x63   : > { %976 = dma.hbm_to_vmem [thread:$0]  (!%p1447_p2), %s1443_s14, 128, %s1445_s26, %s1451_s20, %s1612_s29, %s1612_s29, %s1611_s1  }
  0x64   : > { %p1613_p6 = scmp.ne.s32.totalorder %s1604_s17, 0 }
  0x65   : > { %s1478_s3 = sand.u32 (!%p1613_p6), 1, %s1247_s10   ;;  %p1614_p4 = scmp.ne.s32.totalorder (!%p1613_p6), %s1602_s15, 0 }
  0x66   : > { %352 = sbr.rel (%p1613_p6) target bundleno = 883 (0x373), region = 56  ;;  %s866_s5 = sshll.u32 (!%p1613_p6), %s1478_s3, 3 }
  0x67   : > { %s355_s22 = scalar_lea.sflag (!%p1613_p6), [#allocation3], %s1478_s3  ;;  %s358_s24 = scalar_lea.vmem (!%p1613_p6), [#allocation2], %s866_s5 }
  0x6b   : > { %1226 = dma.done.wait (%p1614_p4), %s355_s22, 128  }
  0x6c   : > { %1228 = vsyncadd (%p1614_p4), %s355_s22, 4294967168  ;;  %p1615_p8 = scmp.eq.s32.totalorder %s1341_s13, 0 }
  0x6e   : > { %1230 = dma.done.wait (%p1615_p8), [#allocation6], 512   ;;  %p1616_p9 = pmov %p1615_p8 }
  0x6f   : > { %p1617_p2 = pmov %p1615_p8 }
  0x70   : > { %1232 = vsyncadd (%p1616_p9), [#allocation6], 4294966784 }
  0x71   : > { %1234 = dma.done.wait (%p1617_p2), [#allocation9], 512   ;;  %p1618_p3 = pmov %p1617_p2 }
  0x72   : > { %v1264_v0 = vmov 0.0   ;;  %vm1265_vm0 = vmmov 0   ;;  %v1034_v1 = vld [vmem:[#allocation5 + $0x8] sm:$0xff]   ;;  %v1035_v2 = vld [vmem:[#allocation5] sm:$0xff]   ;;  %v1036_v3 = vld [vmem:[%s358_s24] sm:$0xff]   ;;  %vm442_vm1 = vcmask 261120   ;;  %v701_v54 = vlaneseq }
  0x73   : > { %1236 = vsyncadd (%p1618_p3), [#allocation9], 4294966784  ;;  %908 = vmatprep.subr.bf16.mxu0 %v1264_v0  ;;  %912 = vmatprep.mubr.msk.bf16.mxu0 %vm1265_vm0, %v1264_v0  ;;  %v1037_v4 = vld [vmem:[#allocation7 + $0x8] sm:$0xff]   ;;  %v1038_v5 = vld [vmem:[#allocation7] sm:$0xff]   ;;  %s1266_s28 = smov 16   ;;  %s1267_s1 = smov 8  }
  0x74   : > { %916 = vmatprep.subr.bf16.mxu1 %v1264_v0  ;;  %920 = vmatprep.mubr.msk.bf16.mxu1 %vm1265_vm0, %v1264_v0  ;;  %v872_v6 = vld [vmem:[%s1585_s2] ss:$0 sm:$0xff]  ;;  %v1039_v16 = vld [vmem:[#allocation10 + $0x8] sm:$0xff]   ;;  %v1040_v17 = vld [vmem:[#allocation8 + $0x8] sm:$0xff]   ;;  %v702_v55 = vand.u32 127, %v701_v54  ;;  %s871_s29 = sshll.u32 %s1478_s3, 4 }
  0x75   : > { %909 = vmatpush3.bf16.msra.mxu0 %v1034_v1  ;;  %917 = vmatpush3.bf16.msra.mxu1 %v1037_v4  ;;  %v1041_v18 = vld [vmem:[#allocation10] sm:$0xff]   ;;  %v1042_v19 = vld [vmem:[#allocation8] sm:$0xff]   ;;  %s408_s5 = scalar_lea.vmem [#allocation11], %s871_s29  ;;  %s895_s24 = sshll.u32 %s1341_s13, 8 }
  0x76   : > { %910 = vmatprep.subr.bf16.mxu0 %v1264_v0  ;;  %918 = vmatprep.subr.bf16.mxu1 %v1264_v0  ;;  %v877_v20 = vld [vmem:[%s1587_s4] ss:$0 sm:$0xff]  ;;  %vm706_vm2 = vcmp.ge.s32.totalorder %v702_v55, 8  ;;  %vm707_vm3 = vcmp.lt.s32.totalorder %v702_v55, 16  ;;  %vm717_vm4 = vcmp.ge.s32.totalorder %v702_v55, 16  ;;  %vm718_vm5 = vcmp.lt.s32.totalorder %v702_v55, 24  ;;  %s1539_s26 = scalar_lea.hbm %s1592_s9, %s895_s24 }
  0x77   : > { %v881_v30 = vld [vmem:[%s1589_s6] ss:$0 sm:$0xff]  ;;  %vm703_vm6 = vcmp.lt.s32.totalorder %v702_v55, 8  ;;  %vm1516_vm7 = vmand %vm706_vm2, %vm707_vm3  ;;  %s744_s22 = sshll.u32 %s408_s5, 4  ;;  %s731_s27 = scalar_lea.sflag [#allocation4], %s1478_s3  ;;  %s1534_s22 = int_to_ptr.vmem [resolvable:$true] %s744_s22 }
  0x78   : > { %v885_v31 = vld [vmem:[%s1591_s8] ss:$0 sm:$0xff]  ;;  %vm1520_vm8 = vmand %vm717_vm4, %vm718_vm5  ;;  %s1183_s14 = scalar_lea.vmem %s1534_s22, 256  ;;  %p1623_p12 = scmp.ne.s32.totalorder %s1609_s19, 0 }
  0x79   : > { %911 = vmatpush3.bf16.msra.mxu0 %v1035_v2  ;;  %919 = vmatpush3.bf16.msra.mxu1 %v1038_v5  ;;  %p1184_p10 = scmp.ne.s32.totalorder %s1534_s22, %s1183_s14  ;;  %s1268_s13 = smov [#allocation11]  }
  0x7a   : > { %924 = vmatprep.subr.bf16.mxu0 %v1264_v0  ;;  %932 = vmatprep.subr.bf16.mxu1 %v1264_v0  ;;  %s1187_s20 = sshll.u32 %s1268_s13, 4  ;;  %s1188_s20 = int_to_ptr.vmem [resolvable:$false] %s1187_s20 }
  0x7b   : > { %p1185_p7 = pnand %p1184_p10, %p1623_p12  ;;  %s1189_s21 = scalar_lea.vmem %s1188_s20, 512 }
  0x7c   : > { %913 = vmatmul.mubr.msk.bf16.vlgmr.msra.gmra.mxu0 %vm442_vm1, %v1036_v3  ;;  %p1190_p13 = scmp.lt.s32.totalorder %s1534_s22, %s1188_s20  ;;  %p1191_p0 = scmp.lt.s32.totalorder %s1189_s21, %s1183_s14 }
  0x7d   : > { %928 = vmatprep.mubr.msk.bf16.mxu0 %vm1265_vm0, %v1264_v0  ;;  %925 = vmatpush3.bf16.msra.mxu0 %v1040_v17  ;;  %p1186_p1 = pneg %p1185_p7 }
  0x7e   : > { %926 = vmatprep.subr.bf16.mxu0 %v1264_v0  ;;  %p1192_p11 = por %p1191_p0, %p1190_p13 }
  0x80   : > { %p1193_p5 = pnand %p1192_p11, %p1186_p1 }
  0x81   : > { %927 = vmatpush3.bf16.msra.mxu0 %v1042_v19 }
 0x13c   : > { %v480_v7 = vpop.f32.mrf.mxu0 }
 0x13d   : > { %v481_v9 = vadd.f32 %v872_v6, %v480_v7 }
 0x13e   : > { %v914_v8 = vpop.f32.mrf.mxu0 }
 0x13f   : > { %v487_v13 = vmax.f32 %v481_v9, 0.0 }
 0x140   : > { %v483_v10 = vpop.f32.mrf.mxu0 }
 0x141   : > { %v484_v11 = vadd.f32 %v872_v6, %v483_v10 }
 0x142   : > { %v915_v12 = vpop.f32.mrf.mxu0 }
 0x143   : > { %v488_v14 = vmax.f32 %v484_v11, 0.0 }
 0x145   : > { %v489_v15 = vpack.c.bf16 %v488_v14, %v487_v13 }
 0x147   : > { %921 = vmatmul.mubr.msk.bf16.vlgmr.msra.gmra.mxu1 %vm442_vm1, %v489_v15 }
 0x148   : > { %936 = vmatprep.mubr.msk.bf16.mxu1 %vm1265_vm0, %v1264_v0  ;;  %933 = vmatpush3.bf16.msra.mxu1 %v1039_v16 }
 0x149   : > { %934 = vmatprep.subr.bf16.mxu1 %v1264_v0 }
 0x14c   : > { %935 = vmatpush3.bf16.msra.mxu1 %v1041_v18 }
 0x207   : > { %v550_v21 = vpop.f32.mrf.mxu1 }
 0x208   : > { %v551_v23 = vadd.f32 %v877_v20, %v550_v21 }
 0x209   : > { %v922_v22 = vpop.f32.mrf.mxu1 }
 0x20a   : > { %v557_v27 = vmax.f32 %v551_v23, 0.0 }
 0x20b   : > { %v553_v24 = vpop.f32.mrf.mxu1 }
 0x20c   : > { %v554_v25 = vadd.f32 %v877_v20, %v553_v24 }
 0x20d   : > { %v923_v26 = vpop.f32.mrf.mxu1 }
 0x20e   : > { %v558_v28 = vmax.f32 %v554_v25, 0.0 }
 0x210   : > { %v559_v29 = vpack.c.bf16 %v558_v28, %v557_v27 }
 0x212   : > { %929 = vmatmul.mubr.msk.bf16.vlgmr.msra.gmra.mxu0 %vm442_vm1, %v559_v29  ;;  %937 = vmatmul.mubr.msk.bf16.vlgmr.msra.gmra.mxu1 %vm442_vm1, %v559_v29 }
 0x2d2   : > { %v620_v32 = vpop.f32.mrf.mxu0  ;;  %v684_v33 = vpop.f32.mrf.mxu1 }
 0x2d3   : > { %v621_v34 = vadd.f32 %v881_v30, %v620_v32  ;;  %v685_v35 = vadd.f32 %v885_v31, %v684_v33 }
 0x2d4   : > { %v930_v36 = vpop.f32.mrf.mxu0  ;;  %v938_v37 = vpop.f32.mrf.mxu1 }
 0x2d5   : > { %1043 = vtanh.f32 %v621_v34  ;;  %v691_v38 = vmax.f32 %v685_v35, -5.0  ;;  %v704_v60 = vsel %vm703_vm6, %v621_v34, 0.0 }
 0x2d6   : > { %v623_v39 = vpop.f32.mrf.mxu0  ;;  %v687_v40 = vpop.f32.mrf.mxu1 }
 0x2d7   : > { %v693_v41 = vmin.f32 %v691_v38, 2.0  ;;  %v624_v42 = vadd.f32 %v881_v30, %v623_v39  ;;  %v688_v43 = vadd.f32 %v885_v31, %v687_v40 }
 0x2d8   : > { %v931_v44 = vpop.f32.mrf.mxu0  ;;  %v939_v45 = vpop.f32.mrf.mxu1 }
 0x2d9   : > { %v695_v46 = vmul.f32 1.442695, %v693_v41  ;;  %1045 = vtanh.f32 %v624_v42  ;;  %v692_v47 = vmax.f32 %v688_v43, -5.0  ;;  %v705_v3 = vsel %vm703_vm6, %v624_v42, 0.0 }
 0x2db   : > { %1047 = vpow2.f32 %v695_v46  ;;  %v694_v48 = vmin.f32 %v692_v47, 2.0 }
 0x2dd   : > { %v697_v49 = vmul.f32 1.442695, %v694_v48 }
 0x2df   : > { %1049 = vpow2.f32 %v697_v49 }
 0x2e2   : > { %v1044_v50 = vpop.eup %1043 }
 0x2e3   : > { %720 = vrot.lane.b32.xlu1 %v1044_v50, %s1266_s28 }
 0x2e6   : > { %v1046_v51 = vpop.eup %1045 }
 0x2e7   : > { %722 = vrot.lane.b32.xlu1 %v1046_v51, %s1266_s28 }
 0x2e8   : > { %v1048_v52 = vpop.eup %1047 }
 0x2e9   : > { %709 = vrot.lane.b32.xlu0 %v1048_v52, %s1267_s1 }
 0x2ec   : > { %v1050_v53 = vpop.eup %1049 }
 0x2ed   : > { %711 = vrot.lane.b32.xlu0 %v1050_v53, %s1267_s1 }
 0x355   : > { %v721_v56 = vpop.permute.xlu1 %720 }
 0x356   : > { %v724_v63 = vsel %vm1520_vm8, %v721_v56, 0.0 }
 0x359   : > { %v723_v0 = vpop.permute.xlu1 %722 }
 0x35a   : > { %v725_v6 = vsel %vm1520_vm8, %v723_v0, 0.0 }
 0x35b   : > { %v710_v59 = vpop.permute.xlu0 %709 }
 0x35c   : > { %v713_v61 = vsel %vm1516_vm7, %v710_v59, 0.0 }
 0x35d   : > { %v715_v62 = vadd.f32 %v713_v61, %v704_v60 }
 0x35f   : > { %v726_v1 = vadd.f32 %v724_v63, %v715_v62  ;;  %v712_v2 = vpop.permute.xlu0 %711 }
 0x360   : > { %v714_v4 = vsel %vm1516_vm7, %v712_v2, 0.0 }
 0x361   : > { %728 = vst [vmem:[%s408_s5] sm:$0xff] %v726_v1  ;;  %v716_v5 = vadd.f32 %v714_v4, %v705_v3 }
 0x363   : > { %v727_v7 = vadd.f32 %v725_v6, %v716_v5 }
 0x365   : > { %729 = vst [vmem:[%s408_s5 + $0x8] sm:$0xff] %v727_v7 }
 0x366   : > { %1196 = shalt.err (!%p1193_p5)
}
 0x367   : > { %s1197_s25 = scalar_lea.hbm %s1539_s26, 256  ;;  %s1201_s5 = scalar_lea.hbm %s1592_s9, 512 }
 0x368   : > { %p1198_p6 = scmp.ne.s32.totalorder %s1539_s26, %s1197_s25  ;;  %p1202_p9 = scmp.lt.s32.totalorder %s1539_s26, %s1592_s9 }
 0x369   : > { %p1203_p2 = scmp.lt.s32.totalorder %s1201_s5, %s1197_s25 }
 0x36a   : > { %p1199_p4 = pnand %p1198_p6, %p1623_p12 }
 0x36b   : > { %p1204_p3 = por %p1203_p2, %p1202_p9 }
 0x36c   : > { %p1200_p8 = pneg %p1199_p4 }
 0x36e   : > { %p1205_p10 = pnand %p1204_p3, %p1200_p8 }
 0x370   : > { %1208 = shalt.err (!%p1205_p10)
}
 0x371   : > { %s1269_s17 = smov 128  }
 0x372   : > { %958 = dma.vmem_to_hbm [thread:$0]  (%p1623_p12), %s1534_s22, 256, %s1539_s26, %s731_s27, %s1269_s17, %s1269_s17, %s1267_s1  }
 0x373 PF: > { %s759_s14 = sand.u32 1, %s1243_s30   ;;  %p1624_p7 = scmp.ne.s32.totalorder %s1603_s16, 0 }
 0x374   : > { %p1625_p1 = scmp.ge.s32.totalorder %s1255_s12, 2  ;;  %s760_s13 = scalar_lea.sflag [#allocation4], %s759_s14 }
 0x376   : > { %p978_p13 = pnand %p1625_p1, %p1624_p7 }
 0x378   : > { %p979_p0 = pneg %p978_p13 }
 0x37a   : > { %1238 = dma.done.wait (%p979_p0), %s760_s13, 256  }
 0x37b   : > { %1240 = vsyncadd (%p979_p0), %s760_s13, 4294967040  ;;  %p24_p11 = scmp.ge.s32.totalorder %s1420_s18, 4   ;;  %s1626_s30 = smov %s1247_s10 }
 0x37c   : > { %s1627_s10 = smov %s1251_s11  ;;  %s1628_s11 = smov %s1436_s23 }
 0x37d   : > { %s1629_s12 = smov %s1420_s18  ;;  %26 = sbr.rel (!%p24_p11) target bundleno = 11 (0xb), region = 117 }
 0x382   :  { %765 = vsyncpa [#allocation3], 1 }
 0x383   :  { %767 = vsyncpa [#allocation3 + $0x1], 1 }
 0x384   :  { %768 = vsyncpa [#allocation6], 1 }
 0x385   :  { %769 = vsyncpa [#allocation9], 1 }
 0x386   :  { %770 = vsyncpa [#allocation4], 1 }
 0x387   :  { %772 = vsyncpa [#allocation4 + $0x1], 1 }

</bundles_post_ra>
